<compile_context>
chip_gen: v7x
topology: tpu7x:2x2x1
jax: 0.10.0
libtpu: 0.0.40
codegen_flags: <defaults>
</compile_context>

<pallas_src>
import jax
import jax.numpy as jnp
from jax.experimental import pallas as pl
from jax.experimental.pallas import tpu as pltpu


def _round_up(a: int, b: int) -> int:
    return (a + b - 1) // b * b


def _mlp_kernel(x_ref, wg_ref, wu_ref, wd_ref, o_ref, acc_ref):
    """One (token-tile, intermediate-tile) step of the fused MLP."""
    k = pl.program_id(1)

    @pl.when(k == 0)
    def _():
        acc_ref[...] = jnp.zeros_like(acc_ref)

    x = x_ref[...]                                              # (tm, H) bf16
    # Gate / up projections for this intermediate tile (f32 MXU accumulation).
    gate = jnp.dot(x, wg_ref[...], preferred_element_type=jnp.float32)
    up = jnp.dot(x, wu_ref[...], preferred_element_type=jnp.float32)
    # SiLU(gate) * up — sigmoid on the EUP, muls on the VPU; both overlap
    # with the MXU work of the surrounding matmuls.
    act = (gate * jax.nn.sigmoid(gate)) * up
    # Partial down projection, accumulated in the resident f32 VMEM scratch.
    acc_ref[...] += jnp.dot(act.astype(wd_ref.dtype), wd_ref[...],
                            preferred_element_type=jnp.float32)

    @pl.when(k == pl.num_programs(1) - 1)
    def _():
        o_ref[...] = acc_ref[...].astype(o_ref.dtype)


def deepseek_v2_mlp(x, w_gate, w_up, w_down, *, tm=256, ti=512,
                    compute_dtype=jnp.bfloat16):
    """x: [T, H]; w_gate/w_up: [H, I]; w_down: [I, H]  -> [T, H] (x.dtype)."""
    T, H = x.shape
    I = w_gate.shape[1]
    assert w_gate.shape == (H, I) and w_up.shape == (H, I) and w_down.shape == (I, H)

    # Intermediate-dim tile (the reduction axis of the fused kernel).
    ti_eff = min(ti, I)
    assert I % ti_eff == 0, "intermediate_size must be divisible by the ti tile"
    nk = I // ti_eff

    # Token tile: large for MXU utilization, but never bigger than needed.
    # Pad tokens (bf16 sublane packing => multiples of 16) instead of asserting.
    tm_eff = min(tm, _round_up(T, 16))
    T_pad = _round_up(T, tm_eff)

    xb = x.astype(compute_dtype)
    if T_pad != T:
        xb = jnp.pad(xb, ((0, T_pad - T), (0, 0)))

    wg = w_gate.astype(compute_dtype)
    wu = w_up.astype(compute_dtype)
    wd = w_down.astype(compute_dtype)

    grid = (T_pad // tm_eff, nk)

    # VMEM budget: double-buffered streamed tiles + resident accumulator.
    itemsize = jnp.dtype(compute_dtype).itemsize
    out_itemsize = jnp.dtype(x.dtype).itemsize
    vmem_bytes = 2 * (tm_eff * H * itemsize            # x tile
                      + 2 * H * ti_eff * itemsize      # gate tile + up tile
                      + ti_eff * H * itemsize          # down tile
                      + tm_eff * H * out_itemsize)     # out tile
    vmem_bytes += tm_eff * H * 4                       # f32 accumulator scratch
    vmem_limit = int(min(max(vmem_bytes * 5 // 4 + (4 << 20), 32 << 20), 100 << 20))

    cost = pl.CostEstimate(
        flops=6 * T_pad * H * I,                       # 2*T*H*2I + 2*T*I*H
        transcendentals=T_pad * I,                     # sigmoid
        bytes_accessed=(xb.size + wg.size + wu.size + wd.size) * itemsize
        + T_pad * H * out_itemsize,
    )

    out = pl.pallas_call(
        _mlp_kernel,
        out_shape=jax.ShapeDtypeStruct((T_pad, H), x.dtype),
        grid_spec=pltpu.PrefetchScalarGridSpec(
            num_scalar_prefetch=0,
            grid=grid,
            in_specs=[
                pl.BlockSpec((tm_eff, H), lambda i, k: (i, 0)),      # x tile (resident over k)
                pl.BlockSpec((H, ti_eff), lambda i, k: (0, k)),      # gate cols k
                pl.BlockSpec((H, ti_eff), lambda i, k: (0, k)),      # up cols k
                pl.BlockSpec((ti_eff, H), lambda i, k: (k, 0)),      # down rows k
            ],
            out_specs=pl.BlockSpec((tm_eff, H), lambda i, k: (i, 0)),
            scratch_shapes=[pltpu.VMEM((tm_eff, H), jnp.float32)],
        ),
        compiler_params=pltpu.CompilerParams(
            dimension_semantics=("parallel", "arbitrary"),
            vmem_limit_bytes=vmem_limit,
        ),
        cost_estimate=cost,
    )(xb, wg, wu, wd)

    return out[:T] if T_pad != T else out


def reference_mlp(x, w_gate, w_up, w_down, compute_dtype=jnp.bfloat16):
    """Pure-JAX reference with the same dtype discipline as the kernel."""
    xb = x.astype(compute_dtype)
    gate = jnp.dot(xb, w_gate.astype(compute_dtype),
                   preferred_element_type=jnp.float32)
    up = jnp.dot(xb, w_up.astype(compute_dtype),
                 preferred_element_type=jnp.float32)
    act = (gate * jax.nn.sigmoid(gate)) * up
    out = jnp.dot(act.astype(compute_dtype), w_down.astype(compute_dtype),
                  preferred_element_type=jnp.float32)
    return out.astype(x.dtype)


if __name__ == "__main__":
    # Small config consistent with the module: hidden_size=256, intermediate_size=512.
    batch, seq, hidden, intermediate = 2, 8, 256, 512
    dtype = jnp.float32

    key = jax.random.PRNGKey(0)
    kx, kg, ku, kd = jax.random.split(key, 4)

    # PyTorch stores Linear weights as [out, in]; we keep them pre-transposed [in, out].
    x_bsd = jax.random.normal(kx, (batch, seq, hidden), dtype=dtype) * 0.5
    w_gate = jax.random.normal(kg, (hidden, intermediate), dtype=dtype) * (hidden ** -0.5)
    w_up = jax.random.normal(ku, (hidden, intermediate), dtype=dtype) * (hidden ** -0.5)
    w_down = jax.random.normal(kd, (intermediate, hidden), dtype=dtype) * (intermediate ** -0.5)

    # Flatten (batch, seq, hidden) -> (tokens, hidden) for the kernel, restore after.
    x = x_bsd.reshape(batch * seq, hidden)

    out = deepseek_v2_mlp(x, w_gate, w_up, w_down, tm=256, ti=512)
    out = jax.block_until_ready(out)
    out_bsd = out.reshape(batch, seq, hidden)

    ref = reference_mlp(x, w_gate, w_up, w_down).reshape(batch, seq, hidden)
    assert out_bsd.shape == (batch, seq, hidden)
    assert jnp.allclose(out_bsd, ref, atol=2e-2, rtol=2e-2), "mismatch vs reference"

    print("KERNEL_OK")
</pallas_src>

<mosaic_0001>
module attributes {stable_mosaic.version = 11 : i64} {
  func.func @_mlp_kernel(%arg0: i32, %arg1: i32, %arg2: memref<16x256xbf16, #tpu.memory_space<vmem>>, %arg3: memref<256x512xbf16, #tpu.memory_space<vmem>>, %arg4: memref<256x512xbf16, #tpu.memory_space<vmem>>, %arg5: memref<512x256xbf16, #tpu.memory_space<vmem>>, %arg6: memref<16x256xf32, #tpu.memory_space<vmem>>, %arg7: memref<16x256xf32, #tpu.memory_space<vmem>>) attributes {dimension_semantics = [#tpu.dimension_semantics<parallel>, #tpu.dimension_semantics<arbitrary>], iteration_bounds = array<i64: 1, 1>, scalar_prefetch = 0 : i64, scratch_operands = 1 : i64, tpu.core_type = #tpu.core_type<tc>, window_params = [{transform_indices = @transform_0, window_bounds = array<i64: 16, 256>}, {transform_indices = @transform_1, window_bounds = array<i64: 256, 512>}, {transform_indices = @transform_2, window_bounds = array<i64: 256, 512>}, {transform_indices = @transform_3, window_bounds = array<i64: 512, 256>}, {transform_indices = @transform_4, window_bounds = array<i64: 16, 256>}]} {
    %c0_i32 = arith.constant 0 : i32
    %0 = arith.cmpi eq, %arg1, %c0_i32 : i32
    %1 = arith.extui %0 : i1 to i32
    %c0_i32_0 = arith.constant 0 : i32
    %2 = arith.cmpi ne, %1, %c0_i32_0 : i32
    scf.if %2 {
      %cst_17 = arith.constant 0.000000e+00 : f32
      %24 = vector.broadcast %cst_17 : f32 to vector<16x256xf32>
      %c0_18 = arith.constant 0 : index
      %c0_19 = arith.constant 0 : index
      %25 = vector.load %arg7[%c0_18, %c0_19] : memref<16x256xf32, #tpu.memory_space<vmem>>, vector<16x256xf32>
      tpu.vector_store %arg7[%c0_18, %c0_19], %24 {strides = array<i32>} : memref<16x256xf32, #tpu.memory_space<vmem>>, vector<16x256xf32>,
    } else {
    }
    %c0 = arith.constant 0 : index
    %c0_1 = arith.constant 0 : index
    %3 = vector.load %arg2[%c0, %c0_1] : memref<16x256xbf16, #tpu.memory_space<vmem>>, vector<16x256xbf16>
    %c0_2 = arith.constant 0 : index
    %c0_3 = arith.constant 0 : index
    %4 = vector.load %arg3[%c0_2, %c0_3] : memref<256x512xbf16, #tpu.memory_space<vmem>>, vector<256x512xbf16>
    %cst = arith.constant dense<0.000000e+00> : vector<16x512xf32>
    %5 = tpu.matmul %3, %4, %cst {dimension_numbers = #tpu.dot_dimension_numbers<[1], [0], [0], [1], [0, 0, 1, 1], [], []>} : vector<16x256xbf16>, vector<256x512xbf16>, vector<16x512xf32> -> vector<16x512xf32>
    %c0_4 = arith.constant 0 : index
    %c0_5 = arith.constant 0 : index
    %6 = vector.load %arg4[%c0_4, %c0_5] : memref<256x512xbf16, #tpu.memory_space<vmem>>, vector<256x512xbf16>
    %cst_6 = arith.constant dense<0.000000e+00> : vector<16x512xf32>
    %7 = tpu.matmul %3, %6, %cst_6 {dimension_numbers = #tpu.dot_dimension_numbers<[1], [0], [0], [1], [0, 0, 1, 1], [], []>} : vector<16x256xbf16>, vector<256x512xbf16>, vector<16x512xf32> -> vector<16x512xf32>
    %8 = arith.negf %5 : vector<16x512xf32>
    %9 = math.exp %8 : vector<16x512xf32>
    %cst_7 = arith.constant 1.000000e+00 : f32
    %10 = vector.broadcast %cst_7 : f32 to vector<16x512xf32>
    %11 = arith.addf %10, %9 : vector<16x512xf32>
    %12 = arith.divf %10, %11 : vector<16x512xf32>
    %13 = arith.mulf %5, %12 : vector<16x512xf32>
    %14 = arith.mulf %13, %7 : vector<16x512xf32>
    %c0_8 = arith.constant 0 : index
    %c0_9 = arith.constant 0 : index
    %15 = vector.load %arg7[%c0_8, %c0_9] : memref<16x256xf32, #tpu.memory_space<vmem>>, vector<16x256xf32>
    %16 = arith.truncf %14 : vector<16x512xf32> to vector<16x512xbf16>
    %c0_10 = arith.constant 0 : index
    %c0_11 = arith.constant 0 : index
    %17 = vector.load %arg5[%c0_10, %c0_11] : memref<512x256xbf16, #tpu.memory_space<vmem>>, vector<512x256xbf16>
    %cst_12 = arith.constant dense<0.000000e+00> : vector<16x256xf32>
    %18 = tpu.matmul %16, %17, %cst_12 {dimension_numbers = #tpu.dot_dimension_numbers<[1], [0], [0], [1], [0, 0, 1, 1], [], []>} : vector<16x512xbf16>, vector<512x256xbf16>, vector<16x256xf32> -> vector<16x256xf32>
    %19 = arith.addf %15, %18 : vector<16x256xf32>
    %c0_13 = arith.constant 0 : index
    %c0_14 = arith.constant 0 : index
    %20 = vector.load %arg7[%c0_13, %c0_14] : memref<16x256xf32, #tpu.memory_space<vmem>>, vector<16x256xf32>
    tpu.vector_store %arg7[%c0_13, %c0_14], %19 {strides = array<i32>} : memref<16x256xf32, #tpu.memory_space<vmem>>, vector<16x256xf32>,
    %c0_i32_15 = arith.constant 0 : i32
    %21 = arith.cmpi eq, %arg1, %c0_i32_15 : i32
    %22 = arith.extui %21 : i1 to i32
    %c0_i32_16 = arith.constant 0 : i32
    %23 = arith.cmpi ne, %22, %c0_i32_16 : i32
    scf.if %23 {
      %c0_17 = arith.constant 0 : index
      %c0_18 = arith.constant 0 : index
      %24 = vector.load %arg7[%c0_17, %c0_18] : memref<16x256xf32, #tpu.memory_space<vmem>>, vector<16x256xf32>
      %c0_19 = arith.constant 0 : index
      %c0_20 = arith.constant 0 : index
      %25 = vector.load %arg6[%c0_19, %c0_20] : memref<16x256xf32, #tpu.memory_space<vmem>>, vector<16x256xf32>
      tpu.vector_store %arg6[%c0_19, %c0_20], %24 {strides = array<i32>} : memref<16x256xf32, #tpu.memory_space<vmem>>, vector<16x256xf32>,
    } else {
    }
    return
  }
  func.func @transform_0(%arg0: i32, %arg1: i32) -> (i32, i32) {
    %c0_i32 = arith.constant 0 : i32
    %c0_i32_0 = arith.constant 0 : i32
    return %arg0, %c0_i32 : i32, i32
  }
  func.func @transform_1(%arg0: i32, %arg1: i32) -> (i32, i32) {
    %c0_i32 = arith.constant 0 : i32
    %c0_i32_0 = arith.constant 0 : i32
    return %c0_i32, %arg1 : i32, i32
  }
  func.func @transform_2(%arg0: i32, %arg1: i32) -> (i32, i32) {
    %c0_i32 = arith.constant 0 : i32
    %c0_i32_0 = arith.constant 0 : i32
    return %c0_i32, %arg1 : i32, i32
  }
  func.func @transform_3(%arg0: i32, %arg1: i32) -> (i32, i32) {
    %c0_i32 = arith.constant 0 : i32
    %c0_i32_0 = arith.constant 0 : i32
    return %arg1, %c0_i32 : i32, i32
  }
  func.func @transform_4(%arg0: i32, %arg1: i32) -> (i32, i32) {
    %c0_i32 = arith.constant 0 : i32
    %c0_i32_0 = arith.constant 0 : i32
    return %arg0, %c0_i32 : i32, i32
  }
}

</mosaic_0001>

<bundles_post_ra>
// kernel: tpu_custom_call.1
= control target key start
LH: loop header
LB: loop body
LE: loop exit
PB: predicated region body
PF: predicated region fallthrough
CT: control target
= control target key end

     0   :  { %9 = vsyncpa [#allocation4], 0  ;;  %s2397_s0 = inlined_call_operand.hbm [shape: bf16[16,256], index: 0, kind: input, shape index: {}]   ;;  %s2398_s1 = inlined_call_operand.hbm [shape: bf16[256,512], index: 1, kind: input, shape index: {}]   ;;  %s2399_s2 = inlined_call_operand.hbm [shape: bf16[256,512], index: 2, kind: input, shape index: {}]   ;;  %s2400_s3 = inlined_call_operand.hbm [shape: bf16[512,256], index: 3, kind: input, shape index: {}]   ;;  %s2401_s4 = inlined_call_operand.hbm [shape: f32[16,256], index: 4, kind: output, shape index: {}]  }
   0x1   :  { %10 = vsyncpa [#allocation7], 0 }
   0x2   :  { %11 = vsyncpa [#allocation10], 0 }
   0x3   :  { %12 = vsyncpa [#allocation5], 0  ;;  %s2269_s15 = smov [#allocation6]   ;;  %s2151_s19 = scalar_lea.hbm %s2398_s1, 8192 }
   0x4   :  { %s30_s16 = sshll.u32 %s2269_s15, 4  ;;  %p2152_p0 = scmp.ne.s32.totalorder %s2398_s1, %s2151_s19  ;;  %s31_s16 = int_to_ptr.vmem [resolvable:$true] %s30_s16 }
   0x5   :  { %p2155_p1 = scmp.lt.u32.totalorder %s2151_s19, %s2398_s1 }
   0x7   :  { %p2157_p2 = pnand %p2155_p1, %p2152_p0 }
   0x9   :  { %2160 = shalt.err (!%p2157_p2)
}
   0xa   :  { %s2161_s24 = scalar_lea.vmem %s31_s16, 8192  ;;  %p2166_p4 = scmp.lt.s32.totalorder %s31_s16, %s31_s16 }
   0xb   :  { %p2162_p3 = scmp.ne.s32.totalorder %s31_s16, %s2161_s24  ;;  %p2167_p5 = scmp.lt.s32.totalorder %s2161_s24, %s2161_s24 }
   0xd   :  { %p2168_p6 = por %p2167_p5, %p2166_p4 }
   0xf   :  { %p2169_p7 = pnand %p2168_p6, %p2162_p3 }
  0x11   :  { %2172 = shalt.err (!%p2169_p7)
}
  0x12   :  { %s2270_s25 = smov 256   ;;  %s2271_s26 = smov 16  }
  0x13   :  { %36 = dma.hbm_to_vmem [thread:$0]  %s2398_s1, 8192, %s31_s16, [#allocation7], %s2270_s25, %s2270_s25, %s2271_s26  }
  0x14   :  { %s2272_s29 = smov [#allocation3]   ;;  %s2173_s7 = scalar_lea.hbm %s2397_s0, 256 }
  0x15   :  { %s18_s30 = sshll.u32 %s2272_s29, 4  ;;  %p2174_p8 = scmp.ne.s32.totalorder %s2397_s0, %s2173_s7  ;;  %s19_s30 = int_to_ptr.vmem [resolvable:$true] %s18_s30 }
  0x16   :  { %p2177_p9 = scmp.lt.u32.totalorder %s2173_s7, %s2397_s0 }
  0x18   :  { %p2179_p10 = pnand %p2177_p9, %p2174_p8 }
  0x1a   :  { %2182 = shalt.err (!%p2179_p10)
}
  0x1b   :  { %s2183_s12 = scalar_lea.vmem %s19_s30, 256  ;;  %p2188_p12 = scmp.lt.s32.totalorder %s19_s30, %s19_s30 }
  0x1c   :  { %p2184_p11 = scmp.ne.s32.totalorder %s19_s30, %s2183_s12  ;;  %p2189_p13 = scmp.lt.s32.totalorder %s2183_s12, %s2183_s12 }
  0x1e   :  { %p2190_p0 = por %p2189_p13, %p2188_p12 }
  0x20   :  { %p2191_p1 = pnand %p2190_p0, %p2184_p11 }
  0x22   :  { %2194 = shalt.err (!%p2191_p1)
}
  0x23   :  { %s2273_s1 = smov 128   ;;  %s2274_s13 = smov 8  }
  0x24   :  { %24 = dma.hbm_to_vmem [thread:$0]  %s2397_s0, 256, %s19_s30, [#allocation4], %s2273_s1, %s2273_s1, %s2274_s13  }
  0x25   :  { %s2275_s16 = smov [#allocation8]   ;;  %s2276_s18 = smov [#allocation9]  }
  0x26   :  { %s42_s17 = sshll.u32 %s2275_s16, 4  ;;  %s54_s19 = sshll.u32 %s2276_s18, 4  ;;  %s43_s17 = int_to_ptr.vmem [resolvable:$true] %s42_s17  ;;  %s2333_s19 = int_to_ptr.vmem [resolvable:$true] %s54_s19 }
  0x27   :  { %s2195_s22 = scalar_lea.hbm %s2399_s2, 8192 }
  0x28   :  { %p2196_p2 = scmp.ne.s32.totalorder %s2399_s2, %s2195_s22  ;;  %p2199_p3 = scmp.lt.u32.totalorder %s2195_s22, %s2399_s2 }
  0x2a   :  { %p2201_p4 = pnand %p2199_p3, %p2196_p2 }
  0x2c   :  { %2204 = shalt.err (!%p2201_p4)
}
  0x2d   :  { %s2205_s0 = scalar_lea.vmem %s43_s17, 8192  ;;  %p2210_p6 = scmp.lt.s32.totalorder %s43_s17, %s43_s17 }
  0x2e   :  { %p2206_p5 = scmp.ne.s32.totalorder %s43_s17, %s2205_s0  ;;  %p2211_p7 = scmp.lt.s32.totalorder %s2205_s0, %s2205_s0 }
  0x30   :  { %p2212_p8 = por %p2211_p7, %p2210_p6 }
  0x32   :  { %p2213_p9 = pnand %p2212_p8, %p2206_p5 }
  0x34   :  { %2216 = shalt.err (!%p2213_p9)
}
  0x35   :  { %48 = dma.hbm_to_vmem [thread:$0]  %s2399_s2, 8192, %s43_s17, [#allocation7], %s2270_s25, %s2270_s25, %s2271_s26  }
  0x36   :  { %s2217_s7 = scalar_lea.hbm %s2400_s3, 8192 }
  0x37   :  { %p2218_p10 = scmp.ne.s32.totalorder %s2400_s3, %s2217_s7  ;;  %p2221_p11 = scmp.lt.u32.totalorder %s2217_s7, %s2400_s3 }
  0x39   :  { %p2223_p12 = pnand %p2221_p11, %p2218_p10 }
  0x3b   :  { %2226 = shalt.err (!%p2223_p12)
}
  0x3c   :  { %s2227_s12 = scalar_lea.vmem %s2333_s19, 8192  ;;  %p2232_p0 = scmp.lt.s32.totalorder %s2333_s19, %s2333_s19 }
  0x3d   :  { %p2228_p13 = scmp.ne.s32.totalorder %s2333_s19, %s2227_s12  ;;  %p2233_p1 = scmp.lt.s32.totalorder %s2227_s12, %s2227_s12 }
  0x3f   :  { %p2234_p2 = por %p2233_p1, %p2232_p0 }
  0x41   :  { %p2235_p3 = pnand %p2234_p2, %p2228_p13 }
  0x43   :  { %2238 = shalt.err (!%p2235_p3)
}
  0x44   :  { %60 = dma.hbm_to_vmem [thread:$0]  %s2400_s3, 8192, %s2333_s19, [#allocation10], %s2273_s1, %s2273_s1, %s2274_s13  }
  0x45   :  { %2261 = dma.done.wait [#allocation4], 256  }
  0x46   :  { %2262 = vsyncadd [#allocation4], 4294967040 }
  0x47   :  { %2263 = dma.done.wait [#allocation7], 16384  }
  0x48   :  { %2264 = vsyncadd [#allocation7], 4294950912 }
  0x49   :  { %2265 = dma.done.wait [#allocation10], 8192  }
  0x4a   :  { %2266 = vsyncadd [#allocation10], 4294959104  ;;  %v1828_v0 = vld [vmem:[#allocation6 + $0x4] ss:$16 sps:$4 sm:$0xff]   ;;  %v1830_v1 = vld [vmem:[#allocation6] ss:$16 sps:$4 sm:$0xff]  }
  0x4b   :  { %477 = vmatprep.subr.bf16.mxu1 %v1828_v0  ;;  %v1831_v2 = vld [vmem:[#allocation6 + $0x24] ss:$16 sps:$4 sm:$0xff]   ;;  %v1833_v3 = vld [vmem:[#allocation6 + $0x20] ss:$16 sps:$4 sm:$0xff]   ;;  %v1908_v60 = vld [vmem:[#allocation6 + $0xc] ss:$16 sps:$4 sm:$0xff]  }
  0x4c   :  { %478 = vmatpush1.bf16.msra.mxu1 %v1830_v1  ;;  %v1834_v4 = vld [vmem:[#allocation6 + $0x44] ss:$16 sps:$4 sm:$0xff]   ;;  %v1836_v5 = vld [vmem:[#allocation6 + $0x40] ss:$16 sps:$4 sm:$0xff]   ;;  %v1906_v63 = vld [vmem:[#allocation6 + $0x8] ss:$16 sps:$4 sm:$0xff]  }
  0x4d   :  { %479 = vmatprep.subr.bf16.mxu1 %v1831_v2  ;;  %v1837_v6 = vld [vmem:[#allocation6 + $0x64] ss:$16 sps:$4 sm:$0xff]   ;;  %v1839_v7 = vld [vmem:[#allocation6 + $0x60] ss:$16 sps:$4 sm:$0xff]   ;;  %v1914_v1 = vld [vmem:[#allocation6 + $0x2c] ss:$16 sps:$4 sm:$0xff]  }
  0x4e   :  { %v1851_v8 = vld [vmem:[#allocation8 + $0x4] ss:$16 sps:$4 sm:$0xff]   ;;  %v1854_v9 = vld [vmem:[#allocation8] ss:$16 sps:$4 sm:$0xff]   ;;  %s2277_s3 = smov [#allocation11]  }
  0x4f   :  { %v1840_v10 = vld [vmem:[#allocation6 + $0x84] ss:$16 sps:$4 sm:$0xff]   ;;  %947 = vmatprep.subr.bf16.mxu0 %v1851_v8  ;;  %v1860_v12 = vld [vmem:[#allocation8 + $0x20] ss:$16 sps:$4 sm:$0xff]   ;;  %v1926_v8 = vld [vmem:[#allocation6 + $0x6c] ss:$16 sps:$4 sm:$0xff]  }
  0x50   :  { %480 = vmatpush1.bf16.msra.mxu1 %v1833_v3  ;;  %v1857_v11 = vld [vmem:[#allocation8 + $0x24] ss:$16 sps:$4 sm:$0xff]   ;;  %948 = vmatpush1.bf16.msra.mxu0 %v1854_v9  ;;  %v1842_v13 = vld [vmem:[#allocation6 + $0x80] ss:$16 sps:$4 sm:$0xff]   ;;  %v1912_v3 = vld [vmem:[#allocation6 + $0x28] ss:$16 sps:$4 sm:$0xff]  }
  0x51   :  { %481 = vmatprep.subr.bf16.mxu1 %v1834_v4  ;;  %949 = vmatprep.subr.bf16.mxu0 %v1857_v11  ;;  %v1843_v14 = vld [vmem:[#allocation6 + $0xa4] ss:$16 sps:$4 sm:$0xff]   ;;  %v1866_v16 = vld [vmem:[#allocation8 + $0x40] ss:$16 sps:$4 sm:$0xff]   ;;  %v1924_v9 = vld [vmem:[#allocation6 + $0x68] ss:$16 sps:$4 sm:$0xff]  }
  0x52   :  { %v1863_v15 = vld [vmem:[#allocation8 + $0x44] ss:$16 sps:$4 sm:$0xff]   ;;  %v1845_v17 = vld [vmem:[#allocation6 + $0xa0] ss:$16 sps:$4 sm:$0xff]   ;;  %v1930_v11 = vld [vmem:[#allocation6 + $0x88] ss:$16 sps:$4 sm:$0xff]  }
  0x53   :  { %v1869_v18 = vld [vmem:[#allocation8 + $0x64] ss:$16 sps:$4 sm:$0xff]   ;;  %v1848_v20 = vld [vmem:[#allocation6 + $0xc0] ss:$16 sps:$4 sm:$0xff]   ;;  %s1599_s1 = sshll.u32 %s2277_s3, 4  ;;  %s1600_s1 = int_to_ptr.vmem [resolvable:$true] %s1599_s1 }
  0x54   :  { %482 = vmatpush1.bf16.msra.mxu1 %v1836_v5  ;;  %950 = vmatpush1.bf16.msra.mxu0 %v1860_v12  ;;  %v1846_v19 = vld [vmem:[#allocation6 + $0xc4] ss:$16 sps:$4 sm:$0xff]   ;;  %v1872_v21 = vld [vmem:[#allocation8 + $0x60] ss:$16 sps:$4 sm:$0xff]   ;;  %v1920_v5 = vld [vmem:[#allocation6 + $0x4c] ss:$16 sps:$4 sm:$0xff]   ;;  %p2244_p5 = scmp.lt.s32.totalorder %s1600_s1, %s1600_s1 }
  0x55   :  { %483 = vmatprep.subr.bf16.mxu1 %v1837_v6  ;;  %951 = vmatprep.subr.bf16.mxu0 %v1863_v15  ;;  %v1875_v22 = vld [vmem:[#allocation8 + $0x84] ss:$16 sps:$4 sm:$0xff]   ;;  %v1878_v24 = vld [vmem:[#allocation8 + $0x80] ss:$16 sps:$4 sm:$0xff]   ;;  %v1938_v12 = vld [vmem:[#allocation6 + $0xac] ss:$16 sps:$4 sm:$0xff]  }
  0x56   :  { %v1849_v23 = vld [vmem:[#allocation6 + $0xe4] ss:$16 sps:$4 sm:$0xff]   ;;  %v1853_v25 = vld [vmem:[#allocation6 + $0xe0] ss:$16 sps:$4 sm:$0xff]   ;;  %v1942_v15 = vld [vmem:[#allocation6 + $0xc8] ss:$16 sps:$4 sm:$0xff]  }
  0x57   :  { %v1881_v26 = vld [vmem:[#allocation8 + $0xa4] ss:$16 sps:$4 sm:$0xff]   ;;  %v1859_v28 = vld [vmem:[#allocation6 + $0x100] ss:$16 sps:$4 sm:$0xff]   ;;  %s2239_s13 = scalar_lea.vmem %s1600_s1, 512 }
  0x58   :  { %484 = vmatpush1.bf16.msra.mxu1 %v1839_v7  ;;  %952 = vmatpush1.bf16.msra.mxu0 %v1866_v16  ;;  %v1855_v27 = vld [vmem:[#allocation6 + $0x104] ss:$16 sps:$4 sm:$0xff]   ;;  %v1884_v29 = vld [vmem:[#allocation8 + $0xa0] ss:$16 sps:$4 sm:$0xff]   ;;  %v1918_v7 = vld [vmem:[#allocation6 + $0x48] ss:$16 sps:$4 sm:$0xff]   ;;  %p2240_p4 = scmp.ne.s32.totalorder %s1600_s1, %s2239_s13  ;;  %p2245_p6 = scmp.lt.s32.totalorder %s2239_s13, %s2239_s13 }
  0x59   :  { %485 = vmatprep.subr.bf16.mxu1 %v1840_v10  ;;  %953 = vmatprep.subr.bf16.mxu0 %v1869_v18  ;;  %v1887_v30 = vld [vmem:[#allocation8 + $0xc4] ss:$16 sps:$4 sm:$0xff]   ;;  %v1890_v32 = vld [vmem:[#allocation8 + $0xc0] ss:$16 sps:$4 sm:$0xff]   ;;  %v1932_v10 = vld [vmem:[#allocation6 + $0x8c] ss:$16 sps:$4 sm:$0xff]  }
  0x5a   :  { %v1861_v31 = vld [vmem:[#allocation6 + $0x124] ss:$16 sps:$4 sm:$0xff]   ;;  %v1865_v34 = vld [vmem:[#allocation6 + $0x120] ss:$16 sps:$4 sm:$0xff]   ;;  %v1950_v18 = vld [vmem:[#allocation6 + $0xec] ss:$16 sps:$4 sm:$0xff]   ;;  %p2246_p7 = por %p2245_p6, %p2244_p5 }
  0x5b   :  { %v2370_v33 = vld [vmem:[#allocation3 + $0x4] ss:$8 sps:$4 sm:$0xff]   ;;  %v1896_v37 = vld [vmem:[#allocation8 + $0xe0] ss:$16 sps:$4 sm:$0xff]  }
  0x5c   :  { %486 = vmatpush1.bf16.msra.mxu1 %v1842_v13  ;;  %954 = vmatpush1.bf16.msra.mxu0 %v1872_v21  ;;  %v1893_v35 = vld [vmem:[#allocation8 + $0xe4] ss:$16 sps:$4 sm:$0xff]   ;;  %v1871_v38 = vld [vmem:[#allocation6 + $0x140] ss:$16 sps:$4 sm:$0xff]   ;;  %v1936_v13 = vld [vmem:[#allocation6 + $0xa8] ss:$16 sps:$4 sm:$0xff]   ;;  %p2247_p8 = pnand %p2246_p7, %p2240_p4 }
  0x5d   :  { %487 = vmatprep.subr.bf16.mxu1 %v1843_v14  ;;  %955 = vmatprep.subr.bf16.mxu0 %v1875_v22  ;;  %v1867_v36 = vld [vmem:[#allocation6 + $0x144] ss:$16 sps:$4 sm:$0xff]   ;;  %v1902_v41 = vld [vmem:[#allocation8 + $0x100] ss:$16 sps:$4 sm:$0xff]   ;;  %v1944_v14 = vld [vmem:[#allocation6 + $0xcc] ss:$16 sps:$4 sm:$0xff]  }
  0x5e   :  { %509 = vmatprep.mubr.bf16.mxu1 %v2370_v33  ;;  %979 = vmatprep.mubr.bf16.mxu0 %v2370_v33  ;;  %v1899_v39 = vld [vmem:[#allocation8 + $0x104] ss:$16 sps:$4 sm:$0xff]   ;;  %v1877_v42 = vld [vmem:[#allocation6 + $0x160] ss:$16 sps:$4 sm:$0xff]   ;;  %v1948_v21 = vld [vmem:[#allocation6 + $0xe8] ss:$16 sps:$4 sm:$0xff]  }
  0x5f   :  { %v1873_v40 = vld [vmem:[#allocation6 + $0x164] ss:$16 sps:$4 sm:$0xff]   ;;  %v1911_v45 = vld [vmem:[#allocation8 + $0x120] ss:$16 sps:$4 sm:$0xff]  }
  0x60   :  { %488 = vmatpush1.bf16.msra.mxu1 %v1845_v17  ;;  %956 = vmatpush1.bf16.msra.mxu0 %v1878_v24  ;;  %v1909_v43 = vld [vmem:[#allocation8 + $0x124] ss:$16 sps:$4 sm:$0xff]   ;;  %v1883_v46 = vld [vmem:[#allocation6 + $0x180] ss:$16 sps:$4 sm:$0xff]   ;;  %v1951_v24 = vld [vmem:[#allocation6 + $0x108] ss:$16 sps:$4 sm:$0xff]  }
  0x61   :  { %489 = vmatprep.subr.bf16.mxu1 %v1846_v19  ;;  %957 = vmatprep.subr.bf16.mxu0 %v1881_v26  ;;  %v1879_v44 = vld [vmem:[#allocation6 + $0x184] ss:$16 sps:$4 sm:$0xff]   ;;  %v1917_v49 = vld [vmem:[#allocation8 + $0x140] ss:$16 sps:$4 sm:$0xff]   ;;  %v1956_v26 = vld [vmem:[#allocation6 + $0x12c] ss:$16 sps:$4 sm:$0xff]  }
  0x62   :  { %v1915_v47 = vld [vmem:[#allocation8 + $0x144] ss:$16 sps:$4 sm:$0xff]   ;;  %v1889_v50 = vld [vmem:[#allocation6 + $0x1a0] ss:$16 sps:$4 sm:$0xff]  }
  0x63   :  { %v1885_v48 = vld [vmem:[#allocation6 + $0x1a4] ss:$16 sps:$4 sm:$0xff]   ;;  %v1923_v53 = vld [vmem:[#allocation8 + $0x160] ss:$16 sps:$4 sm:$0xff]  }
  0x64   :  { %490 = vmatpush1.bf16.msra.mxu1 %v1848_v20  ;;  %958 = vmatpush1.bf16.msra.mxu0 %v1884_v29  ;;  %v1921_v51 = vld [vmem:[#allocation8 + $0x164] ss:$16 sps:$4 sm:$0xff]   ;;  %v1895_v54 = vld [vmem:[#allocation6 + $0x1c0] ss:$16 sps:$4 sm:$0xff]   ;;  %v1954_v29 = vld [vmem:[#allocation6 + $0x128] ss:$16 sps:$4 sm:$0xff]  }
  0x65   :  { %491 = vmatprep.subr.bf16.mxu1 %v1849_v23  ;;  %959 = vmatprep.subr.bf16.mxu0 %v1887_v30  ;;  %v1891_v52 = vld [vmem:[#allocation6 + $0x1c4] ss:$16 sps:$4 sm:$0xff]   ;;  %v1929_v57 = vld [vmem:[#allocation8 + $0x180] ss:$16 sps:$4 sm:$0xff]   ;;  %v1953_v23 = vld [vmem:[#allocation6 + $0x10c] ss:$16 sps:$4 sm:$0xff]  }
  0x66   :  { %v1927_v55 = vld [vmem:[#allocation8 + $0x184] ss:$16 sps:$4 sm:$0xff]   ;;  %v1901_v58 = vld [vmem:[#allocation6 + $0x1e0] ss:$16 sps:$4 sm:$0xff]  }
  0x67   :  { %v1897_v56 = vld [vmem:[#allocation6 + $0x1e4] ss:$16 sps:$4 sm:$0xff]   ;;  %v2374_v61 = vld [vmem:[#allocation3] ss:$8 sps:$4 sm:$0xff]   ;;  %v2023_v16 = vld [vmem:[#allocation9] ss:$8 sps:$4 sm:$0xff]  }
  0x68   :  { %492 = vmatpush1.bf16.msra.mxu1 %v1853_v25  ;;  %960 = vmatpush1.bf16.msra.mxu0 %v1890_v32  ;;  %v1933_v59 = vld [vmem:[#allocation8 + $0x1a4] ss:$16 sps:$4 sm:$0xff]   ;;  %v1935_v62 = vld [vmem:[#allocation8 + $0x1a0] ss:$16 sps:$4 sm:$0xff]  }
  0x69   :  { %493 = vmatprep.subr.bf16.mxu1 %v1855_v27  ;;  %961 = vmatprep.subr.bf16.mxu0 %v1893_v35  ;;  %v1939_v0 = vld [vmem:[#allocation8 + $0x1c4] ss:$16 sps:$4 sm:$0xff]   ;;  %v1941_v2 = vld [vmem:[#allocation8 + $0x1c0] ss:$16 sps:$4 sm:$0xff]  }
  0x6a   :  { %v1945_v4 = vld [vmem:[#allocation8 + $0x1e4] ss:$16 sps:$4 sm:$0xff]   ;;  %v1947_v6 = vld [vmem:[#allocation8 + $0x1e0] ss:$16 sps:$4 sm:$0xff]  }
  0x6b   :  { %v2025_v17 = vld [vmem:[#allocation9 + $0x4] ss:$8 sps:$4 sm:$0xff]   ;;  %v2028_v19 = vld [vmem:[#allocation9 + $0x14] ss:$8 sps:$4 sm:$0xff]   ;;  %v2026_v20 = vld [vmem:[#allocation9 + $0x10] ss:$8 sps:$4 sm:$0xff]  }
  0x6c   :  { %494 = vmatpush1.bf16.msra.mxu1 %v1859_v28  ;;  %962 = vmatpush1.bf16.msra.mxu0 %v1896_v37  ;;  %v2031_v22 = vld [vmem:[#allocation9 + $0x24] ss:$8 sps:$4 sm:$0xff]   ;;  %v2029_v25 = vld [vmem:[#allocation9 + $0x20] ss:$8 sps:$4 sm:$0xff]   ;;  %v2034_v27 = vld [vmem:[#allocation9 + $0x34] ss:$8 sps:$4 sm:$0xff]  }
  0x6d   :  { %495 = vmatprep.subr.bf16.mxu1 %v1861_v31  ;;  %963 = vmatprep.subr.bf16.mxu0 %v1899_v39  ;;  %v2032_v28 = vld [vmem:[#allocation9 + $0x30] ss:$8 sps:$4 sm:$0xff]   ;;  %v2037_v30 = vld [vmem:[#allocation9 + $0x44] ss:$8 sps:$4 sm:$0xff]   ;;  %v2035_v32 = vld [vmem:[#allocation9 + $0x40] ss:$8 sps:$4 sm:$0xff]  }
  0x6e   :  { %v1959_v31 = vld [vmem:[#allocation6 + $0x14c] ss:$16 sps:$4 sm:$0xff]   ;;  %v2038_v37 = vld [vmem:[#allocation9 + $0x50] ss:$8 sps:$4 sm:$0xff]  }
  0x6f   :  { %v2040_v35 = vld [vmem:[#allocation9 + $0x54] ss:$8 sps:$4 sm:$0xff]   ;;  %v2043_v39 = vld [vmem:[#allocation9 + $0x64] ss:$8 sps:$4 sm:$0xff]  }
  0x70   :  { %496 = vmatpush1.bf16.msra.mxu1 %v1865_v34  ;;  %964 = vmatpush1.bf16.msra.mxu0 %v1902_v41  ;;  %v1957_v34 = vld [vmem:[#allocation6 + $0x148] ss:$16 sps:$4 sm:$0xff]  }
  0x71   :  { %497 = vmatprep.subr.bf16.mxu1 %v1867_v36  ;;  %965 = vmatprep.subr.bf16.mxu0 %v1909_v43  ;;  %v1962_v36 = vld [vmem:[#allocation6 + $0x16c] ss:$16 sps:$4 sm:$0xff]   ;;  %v2041_v41 = vld [vmem:[#allocation9 + $0x60] ss:$8 sps:$4 sm:$0xff]  }
  0x72   :  { %v1968_v43 = vld [vmem:[#allocation6 + $0x1ac] ss:$16 sps:$4 sm:$0xff]  }
  0x74   :  { %498 = vmatpush1.bf16.msra.mxu1 %v1871_v38  ;;  %966 = vmatpush1.bf16.msra.mxu0 %v1911_v45  ;;  %v1960_v38 = vld [vmem:[#allocation6 + $0x168] ss:$16 sps:$4 sm:$0xff]   ;;  %v1971_v45 = vld [vmem:[#allocation6 + $0x1cc] ss:$16 sps:$4 sm:$0xff]  }
  0x75   :  { %499 = vmatprep.subr.bf16.mxu1 %v1873_v40  ;;  %967 = vmatprep.subr.bf16.mxu0 %v1915_v47  ;;  %v1965_v40 = vld [vmem:[#allocation6 + $0x18c] ss:$16 sps:$4 sm:$0xff]  }
  0x76   :  { %v1974_v47 = vld [vmem:[#allocation6 + $0x1ec] ss:$16 sps:$4 sm:$0xff]  }
  0x78   :  { %500 = vmatpush1.bf16.msra.mxu1 %v1877_v42  ;;  %968 = vmatpush1.bf16.msra.mxu0 %v1917_v49  ;;  %v1963_v42 = vld [vmem:[#allocation6 + $0x188] ss:$16 sps:$4 sm:$0xff]   ;;  %v1977_v49 = vld [vmem:[#allocation8 + $0xc] ss:$16 sps:$4 sm:$0xff]  }
  0x79   :  { %501 = vmatprep.subr.bf16.mxu1 %v1879_v44  ;;  %969 = vmatprep.subr.bf16.mxu0 %v1921_v51  ;;  %v1966_v44 = vld [vmem:[#allocation6 + $0x1a8] ss:$16 sps:$4 sm:$0xff]   ;;  %v1980_v51 = vld [vmem:[#allocation8 + $0x2c] ss:$16 sps:$4 sm:$0xff]  }
  0x7c   :  { %502 = vmatpush1.bf16.msra.mxu1 %v1883_v46  ;;  %970 = vmatpush1.bf16.msra.mxu0 %v1923_v53  ;;  %v1969_v46 = vld [vmem:[#allocation6 + $0x1c8] ss:$16 sps:$4 sm:$0xff]   ;;  %v1983_v53 = vld [vmem:[#allocation8 + $0x4c] ss:$16 sps:$4 sm:$0xff]  }
  0x7d   :  { %503 = vmatprep.subr.bf16.mxu1 %v1885_v48  ;;  %971 = vmatprep.subr.bf16.mxu0 %v1927_v55  ;;  %v1972_v48 = vld [vmem:[#allocation6 + $0x1e8] ss:$16 sps:$4 sm:$0xff]   ;;  %v1986_v55 = vld [vmem:[#allocation8 + $0x6c] ss:$16 sps:$4 sm:$0xff]  }
  0x80   :  { %504 = vmatpush1.bf16.msra.mxu1 %v1889_v50  ;;  %972 = vmatpush1.bf16.msra.mxu0 %v1929_v57  ;;  %v1975_v50 = vld [vmem:[#allocation8 + $0x8] ss:$16 sps:$4 sm:$0xff]   ;;  %v1989_v57 = vld [vmem:[#allocation8 + $0x8c] ss:$16 sps:$4 sm:$0xff]  }
  0x81   :  { %505 = vmatprep.subr.bf16.mxu1 %v1891_v52  ;;  %973 = vmatprep.subr.bf16.mxu0 %v1933_v59  ;;  %v1978_v52 = vld [vmem:[#allocation8 + $0x28] ss:$16 sps:$4 sm:$0xff]   ;;  %v1992_v59 = vld [vmem:[#allocation8 + $0xac] ss:$16 sps:$4 sm:$0xff]  }
  0x84   :  { %506 = vmatpush1.bf16.msra.mxu1 %v1895_v54  ;;  %974 = vmatpush1.bf16.msra.mxu0 %v1935_v62  ;;  %v1981_v54 = vld [vmem:[#allocation8 + $0x48] ss:$16 sps:$4 sm:$0xff]   ;;  %v1995_v62 = vld [vmem:[#allocation8 + $0xcc] ss:$16 sps:$4 sm:$0xff]  }
  0x85   :  { %507 = vmatprep.subr.bf16.mxu1 %v1897_v56  ;;  %975 = vmatprep.subr.bf16.mxu0 %v1939_v0  ;;  %v1984_v56 = vld [vmem:[#allocation8 + $0x68] ss:$16 sps:$4 sm:$0xff]  }
  0x86   :  { %v1993_v0 = vld [vmem:[#allocation8 + $0xc8] ss:$16 sps:$4 sm:$0xff]  }
  0x88   :  { %508 = vmatpush1.bf16.msra.mxu1 %v1901_v58  ;;  %976 = vmatpush1.bf16.msra.mxu0 %v1941_v2  ;;  %v1987_v58 = vld [vmem:[#allocation8 + $0x88] ss:$16 sps:$4 sm:$0xff]   ;;  %v2049_v2 = vld [vmem:[#allocation9 + $0x84] ss:$8 sps:$4 sm:$0xff]  }
  0x89   :  { %520 = vmatprep.subr.bf16.mxu1 %v1908_v60  ;;  %977 = vmatprep.subr.bf16.mxu0 %v1945_v4  ;;  %v1990_v60 = vld [vmem:[#allocation8 + $0xa8] ss:$16 sps:$4 sm:$0xff]  }
  0x8a   :  { %v1996_v4 = vld [vmem:[#allocation8 + $0xe8] ss:$16 sps:$4 sm:$0xff]  }
  0x8b   :  { %510 = vmatmul.mubr.bf16.vlgmr.msra.gmra.mrb[0].mxu1 %v2374_v61 }
  0x8c   :  { %521 = vmatpush1.bf16.msra.mxu1 %v1906_v63  ;;  %552 = vmatprep.mubr.bf16.mxu1 %v2370_v33  ;;  %v2046_v63 = vld [vmem:[#allocation9 + $0x74] ss:$8 sps:$4 sm:$0xff]  }
  0x8d   :  { %522 = vmatprep.subr.bf16.mxu1 %v1914_v1  ;;  %978 = vmatpush1.bf16.msra.mxu0 %v1947_v6  ;;  %v1998_v1 = vld [vmem:[#allocation8 + $0xec] ss:$16 sps:$4 sm:$0xff]  }
  0x8e   :  { %1489 = vmatprep.subr.bf16.mxu0 %v2025_v17  ;;  %v2052_v6 = vld [vmem:[#allocation9 + $0x94] ss:$8 sps:$4 sm:$0xff]  }
  0x8f   :  { %v2010_v17 = vld [vmem:[#allocation8 + $0x16c] ss:$16 sps:$4 sm:$0xff]  }
  0x90   :  { %523 = vmatpush1.bf16.msra.mxu1 %v1912_v3  ;;  %980 = vmatmul.mubr.bf16.vlgmr.msra.gmra.mrb[0].mxu0 %v2374_v61  ;;  %v2047_v3 = vld [vmem:[#allocation9 + $0x80] ss:$8 sps:$4 sm:$0xff]  }
  0x91   :  { %524 = vmatprep.subr.bf16.mxu1 %v1920_v5  ;;  %1490 = vmatpush1.bf16.msra.mxu0 %v2023_v16  ;;  %v2001_v5 = vld [vmem:[#allocation8 + $0x10c] ss:$16 sps:$4 sm:$0xff]   ;;  %v2005_v16 = vld [vmem:[#allocation8 + $0x148] ss:$16 sps:$4 sm:$0xff]  }
  0x92   :  { %1491 = vmatprep.subr.bf16.mxu0 %v2028_v19  ;;  %v2059_v19 = vld [vmem:[#allocation9 + $0xc0] ss:$8 sps:$4 sm:$0xff]  }
  0x94   :  { %525 = vmatpush1.bf16.msra.mxu1 %v1918_v7  ;;  %v2050_v7 = vld [vmem:[#allocation9 + $0x90] ss:$8 sps:$4 sm:$0xff]  }
  0x95   :  { %526 = vmatprep.subr.bf16.mxu1 %v1926_v8  ;;  %1492 = vmatpush1.bf16.msra.mxu0 %v2026_v20  ;;  %v1999_v8 = vld [vmem:[#allocation8 + $0x108] ss:$16 sps:$4 sm:$0xff]  }
  0x96   :  { %1493 = vmatprep.subr.bf16.mxu0 %v2031_v22  ;;  %v2008_v20 = vld [vmem:[#allocation8 + $0x168] ss:$16 sps:$4 sm:$0xff]   ;;  %v2064_v22 = vld [vmem:[#allocation9 + $0xd4] ss:$8 sps:$4 sm:$0xff]  }
  0x98   :  { %527 = vmatpush1.bf16.msra.mxu1 %v1924_v9  ;;  %v2004_v9 = vld [vmem:[#allocation8 + $0x12c] ss:$16 sps:$4 sm:$0xff]  }
  0x99   :  { %528 = vmatprep.subr.bf16.mxu1 %v1932_v10  ;;  %1494 = vmatpush1.bf16.msra.mxu0 %v2029_v25  ;;  %v2055_v10 = vld [vmem:[#allocation9 + $0xa4] ss:$8 sps:$4 sm:$0xff]  }
  0x9a   :  { %1495 = vmatprep.subr.bf16.mxu0 %v2034_v27  ;;  %v2016_v25 = vld [vmem:[#allocation8 + $0x1ac] ss:$16 sps:$4 sm:$0xff]   ;;  %v2065_v27 = vld [vmem:[#allocation9 + $0xe0] ss:$8 sps:$4 sm:$0xff]  }
  0x9c   :  { %529 = vmatpush1.bf16.msra.mxu1 %v1930_v11  ;;  %v2053_v11 = vld [vmem:[#allocation9 + $0xa0] ss:$8 sps:$4 sm:$0xff]  }
  0x9d   :  { %530 = vmatprep.subr.bf16.mxu1 %v1938_v12  ;;  %1496 = vmatpush1.bf16.msra.mxu0 %v2032_v28  ;;  %v2002_v12 = vld [vmem:[#allocation8 + $0x128] ss:$16 sps:$4 sm:$0xff]  }
  0x9e   :  { %1497 = vmatprep.subr.bf16.mxu0 %v2037_v30  ;;  %v2014_v28 = vld [vmem:[#allocation8 + $0x1a8] ss:$16 sps:$4 sm:$0xff]   ;;  %v2070_v30 = vld [vmem:[#allocation9 + $0xf4] ss:$8 sps:$4 sm:$0xff]  }
  0xa0   :  { %531 = vmatpush1.bf16.msra.mxu1 %v1936_v13  ;;  %v2007_v13 = vld [vmem:[#allocation8 + $0x14c] ss:$16 sps:$4 sm:$0xff]  }
  0xa1   :  { %532 = vmatprep.subr.bf16.mxu1 %v1944_v14  ;;  %1498 = vmatpush1.bf16.msra.mxu0 %v2035_v32  ;;  %v2058_v14 = vld [vmem:[#allocation9 + $0xb4] ss:$8 sps:$4 sm:$0xff]   ;;  %v2017_v32 = vld [vmem:[#allocation8 + $0x1c8] ss:$16 sps:$4 sm:$0xff]  }
  0xa2   :  { %1499 = vmatprep.subr.bf16.mxu0 %v2040_v35  ;;  %v2020_v35 = vld [vmem:[#allocation8 + $0x1e8] ss:$16 sps:$4 sm:$0xff]  }
  0xa4   :  { %533 = vmatpush1.bf16.msra.mxu1 %v1942_v15  ;;  %v2056_v15 = vld [vmem:[#allocation9 + $0xb0] ss:$8 sps:$4 sm:$0xff]  }
  0xa5   :  { %534 = vmatprep.subr.bf16.mxu1 %v1950_v18  ;;  %1500 = vmatpush1.bf16.msra.mxu0 %v2038_v37  ;;  %v2061_v18 = vld [vmem:[#allocation9 + $0xc4] ss:$8 sps:$4 sm:$0xff]  }
  0xa6   :  { %1501 = vmatprep.subr.bf16.mxu0 %v2043_v39 }
  0xa8   :  { %535 = vmatpush1.bf16.msra.mxu1 %v1948_v21  ;;  %v2013_v21 = vld [vmem:[#allocation8 + $0x18c] ss:$16 sps:$4 sm:$0xff]  }
  0xa9   :  { %536 = vmatprep.subr.bf16.mxu1 %v1953_v23  ;;  %1502 = vmatpush1.bf16.msra.mxu0 %v2041_v41  ;;  %v2062_v23 = vld [vmem:[#allocation9 + $0xd0] ss:$8 sps:$4 sm:$0xff]  }
  0xaa   :  { %1503 = vmatprep.subr.bf16.mxu0 %v2046_v63 }
  0xac   :  { %537 = vmatpush1.bf16.msra.mxu1 %v1951_v24  ;;  %v2011_v24 = vld [vmem:[#allocation8 + $0x188] ss:$16 sps:$4 sm:$0xff]  }
  0xad   :  { %538 = vmatprep.subr.bf16.mxu1 %v1956_v26  ;;  %v2067_v26 = vld [vmem:[#allocation9 + $0xe4] ss:$8 sps:$4 sm:$0xff]  }
  0xb0   :  { %539 = vmatpush1.bf16.msra.mxu1 %v1954_v29  ;;  %v2019_v29 = vld [vmem:[#allocation8 + $0x1cc] ss:$16 sps:$4 sm:$0xff]  }
  0xb1   :  { %540 = vmatprep.subr.bf16.mxu1 %v1959_v31  ;;  %v2068_v31 = vld [vmem:[#allocation9 + $0xf0] ss:$8 sps:$4 sm:$0xff]  }
  0xb4   :  { %541 = vmatpush1.bf16.msra.mxu1 %v1957_v34  ;;  %v2022_v34 = vld [vmem:[#allocation8 + $0x1ec] ss:$16 sps:$4 sm:$0xff]  }
  0xb5   :  { %542 = vmatprep.subr.bf16.mxu1 %v1962_v36  ;;  %v2073_v36 = vld [vmem:[#allocation9 + $0x104] ss:$8 sps:$4 sm:$0xff]  }
  0xb8   :  { %543 = vmatpush1.bf16.msra.mxu1 %v1960_v38 }
  0xb9   :  { %544 = vmatprep.subr.bf16.mxu1 %v1965_v40 }
  0xbc   :  { %545 = vmatpush1.bf16.msra.mxu1 %v1963_v42 }
  0xbd   :  { %546 = vmatprep.subr.bf16.mxu1 %v1968_v43 }
  0xc0   :  { %547 = vmatpush1.bf16.msra.mxu1 %v1966_v44 }
  0xc1   :  { %548 = vmatprep.subr.bf16.mxu1 %v1971_v45 }
  0xc4   :  { %549 = vmatpush1.bf16.msra.mxu1 %v1969_v46 }
  0xc5   :  { %550 = vmatprep.subr.bf16.mxu1 %v1974_v47 }
  0xc8   :  { %551 = vmatpush1.bf16.msra.mxu1 %v1972_v48 }
  0xc9   :  { %990 = vmatprep.subr.bf16.mxu1 %v1977_v49 }
  0xcb   :  { %553 = vmatmul.mubr.bf16.vlgmr.msra.gmra.mrb[4].mxu1 %v2374_v61 }
  0xcc   :  { %991 = vmatpush1.bf16.msra.mxu1 %v1975_v50  ;;  %1022 = vmatprep.mubr.bf16.mxu1 %v2370_v33  ;;  %v2044_v33 = vld [vmem:[#allocation9 + $0x70] ss:$8 sps:$4 sm:$0xff]  }
  0xcd   :  { %992 = vmatprep.subr.bf16.mxu1 %v1980_v51  ;;  %1504 = vmatpush1.bf16.msra.mxu0 %v2044_v33 }
  0xce   :  { %1505 = vmatprep.subr.bf16.mxu0 %v2049_v2 }
  0xd0   :  { %993 = vmatpush1.bf16.msra.mxu1 %v1978_v52 }
  0xd1   :  { %994 = vmatprep.subr.bf16.mxu1 %v1983_v53  ;;  %1506 = vmatpush1.bf16.msra.mxu0 %v2047_v3 }
  0xd2   :  { %1507 = vmatprep.subr.bf16.mxu0 %v2052_v6  ;;  %v2071_v6 = vld [vmem:[#allocation9 + $0x100] ss:$8 sps:$4 sm:$0xff]  }
  0xd4   :  { %995 = vmatpush1.bf16.msra.mxu1 %v1981_v54 }
  0xd5   :  { %996 = vmatprep.subr.bf16.mxu1 %v1986_v55  ;;  %1508 = vmatpush1.bf16.msra.mxu0 %v2050_v7  ;;  %v2076_v7 = vld [vmem:[#allocation9 + $0x114] ss:$8 sps:$4 sm:$0xff]  }
  0xd6   :  { %1509 = vmatprep.subr.bf16.mxu0 %v2055_v10  ;;  %v2077_v10 = vld [vmem:[#allocation9 + $0x120] ss:$8 sps:$4 sm:$0xff]  }
  0xd8   :  { %997 = vmatpush1.bf16.msra.mxu1 %v1984_v56 }
  0xd9   :  { %998 = vmatprep.subr.bf16.mxu1 %v1989_v57  ;;  %1510 = vmatpush1.bf16.msra.mxu0 %v2053_v11  ;;  %v2082_v11 = vld [vmem:[#allocation9 + $0x134] ss:$8 sps:$4 sm:$0xff]  }
  0xda   :  { %1511 = vmatprep.subr.bf16.mxu0 %v2058_v14  ;;  %v2083_v14 = vld [vmem:[#allocation9 + $0x140] ss:$8 sps:$4 sm:$0xff]  }
  0xdc   :  { %999 = vmatpush1.bf16.msra.mxu1 %v1987_v58 }
  0xdd   :  { %1000 = vmatprep.subr.bf16.mxu1 %v1992_v59  ;;  %1512 = vmatpush1.bf16.msra.mxu0 %v2056_v15  ;;  %v2088_v15 = vld [vmem:[#allocation9 + $0x154] ss:$8 sps:$4 sm:$0xff]  }
  0xde   :  { %1513 = vmatprep.subr.bf16.mxu0 %v2061_v18  ;;  %v2089_v18 = vld [vmem:[#allocation9 + $0x160] ss:$8 sps:$4 sm:$0xff]  }
  0xe0   :  { %1001 = vmatpush1.bf16.msra.mxu1 %v1990_v60 }
  0xe1   :  { %1002 = vmatprep.subr.bf16.mxu1 %v1995_v62  ;;  %1514 = vmatpush1.bf16.msra.mxu0 %v2059_v19  ;;  %v2094_v19 = vld [vmem:[#allocation9 + $0x174] ss:$8 sps:$4 sm:$0xff]  }
  0xe2   :  { %1515 = vmatprep.subr.bf16.mxu0 %v2064_v22 }
  0xe4   :  { %1003 = vmatpush1.bf16.msra.mxu1 %v1993_v0 }
  0xe5   :  { %1004 = vmatprep.subr.bf16.mxu1 %v1998_v1  ;;  %1516 = vmatpush1.bf16.msra.mxu0 %v2062_v23 }
  0xe6   :  { %1517 = vmatprep.subr.bf16.mxu0 %v2067_v26 }
  0xe8   :  { %1005 = vmatpush1.bf16.msra.mxu1 %v1996_v4 }
  0xe9   :  { %1006 = vmatprep.subr.bf16.mxu1 %v2001_v5  ;;  %1518 = vmatpush1.bf16.msra.mxu0 %v2065_v27  ;;  %v2100_v27 = vld [vmem:[#allocation9 + $0x194] ss:$8 sps:$4 sm:$0xff]  }
  0xea   :  { %1519 = vmatprep.subr.bf16.mxu0 %v2070_v30  ;;  %v2101_v30 = vld [vmem:[#allocation9 + $0x1a0] ss:$8 sps:$4 sm:$0xff]  }
  0xec   :  { %1007 = vmatpush1.bf16.msra.mxu1 %v1999_v8  ;;  %v2074_v8 = vld [vmem:[#allocation9 + $0x110] ss:$8 sps:$4 sm:$0xff]  }
  0xed   :  { %1008 = vmatprep.subr.bf16.mxu1 %v2004_v9  ;;  %1520 = vmatpush1.bf16.msra.mxu0 %v2068_v31  ;;  %v2079_v9 = vld [vmem:[#allocation9 + $0x124] ss:$8 sps:$4 sm:$0xff]   ;;  %v2106_v31 = vld [vmem:[#allocation9 + $0x1b4] ss:$8 sps:$4 sm:$0xff]  }
  0xee   :  { %1532 = vmatprep.subr.bf16.mxu0 %v2073_v36  ;;  %v2112_v36 = vld [vmem:[#allocation9 + $0x1d4] ss:$8 sps:$4 sm:$0xff]  }
  0xf0   :  { %1009 = vmatpush1.bf16.msra.mxu1 %v2002_v12  ;;  %v2080_v12 = vld [vmem:[#allocation9 + $0x130] ss:$8 sps:$4 sm:$0xff]  }
  0xf1   :  { %1010 = vmatprep.subr.bf16.mxu1 %v2007_v13  ;;  %v2085_v13 = vld [vmem:[#allocation9 + $0x144] ss:$8 sps:$4 sm:$0xff]  }
  0xf4   :  { %1011 = vmatpush1.bf16.msra.mxu1 %v2005_v16  ;;  %v2086_v16 = vld [vmem:[#allocation9 + $0x150] ss:$8 sps:$4 sm:$0xff]  }
  0xf5   :  { %1012 = vmatprep.subr.bf16.mxu1 %v2010_v17  ;;  %v2091_v17 = vld [vmem:[#allocation9 + $0x164] ss:$8 sps:$4 sm:$0xff]  }
  0xf8   :  { %1013 = vmatpush1.bf16.msra.mxu1 %v2008_v20  ;;  %v2092_v20 = vld [vmem:[#allocation9 + $0x170] ss:$8 sps:$4 sm:$0xff]  }
  0xf9   :  { %1014 = vmatprep.subr.bf16.mxu1 %v2013_v21  ;;  %v2097_v21 = vld [vmem:[#allocation9 + $0x184] ss:$8 sps:$4 sm:$0xff]  }
  0xfc   :  { %1015 = vmatpush1.bf16.msra.mxu1 %v2011_v24 }
  0xfd   :  { %1016 = vmatprep.subr.bf16.mxu1 %v2016_v25  ;;  %v2095_v25 = vld [vmem:[#allocation9 + $0x180] ss:$8 sps:$4 sm:$0xff]  }
 0x100   :  { %1017 = vmatpush1.bf16.msra.mxu1 %v2014_v28  ;;  %v2098_v28 = vld [vmem:[#allocation9 + $0x190] ss:$8 sps:$4 sm:$0xff]  }
 0x101   :  { %1018 = vmatprep.subr.bf16.mxu1 %v2019_v29  ;;  %v2103_v29 = vld [vmem:[#allocation9 + $0x1a4] ss:$8 sps:$4 sm:$0xff]  }
 0x104   :  { %1019 = vmatpush1.bf16.msra.mxu1 %v2017_v32  ;;  %v2104_v32 = vld [vmem:[#allocation9 + $0x1b0] ss:$8 sps:$4 sm:$0xff]  }
 0x105   :  { %1020 = vmatprep.subr.bf16.mxu1 %v2022_v34  ;;  %v2109_v34 = vld [vmem:[#allocation9 + $0x1c4] ss:$8 sps:$4 sm:$0xff]  }
 0x108   :  { %1021 = vmatpush1.bf16.msra.mxu1 %v2020_v35  ;;  %v2107_v35 = vld [vmem:[#allocation9 + $0x1c0] ss:$8 sps:$4 sm:$0xff]  }
 0x10b   :  { %1023 = vmatmul.mubr.bf16.vlgmr.msra.gmra.mrb[8].mxu1 %v2374_v61 }
 0x15e   :  { %v511_v37 = vpop.f32.mrb[0].mxu1 }
 0x15f   :  { %v1743_v38 = vmul.f32 -1.442695, %v511_v37  ;;  %v513_v39 = vpop.f32.mrb[1].mxu1 }
 0x160   :  { %v1744_v40 = vmul.f32 -1.442695, %v513_v39  ;;  %v515_v41 = vpop.f32.mrb[2].mxu1 }
 0x161   :  { %2119 = vpow2.f32 %v1743_v38  ;;  %v1747_v42 = vmul.f32 -1.442695, %v515_v41  ;;  %v517_v43 = vpop.f32.mrb[3].mxu1  ;;  %v2115_v38 = vld [vmem:[#allocation9 + $0x1e4] ss:$8 sps:$4 sm:$0xff]  }
 0x162   :  { %2121 = vpow2.f32 %v1744_v40  ;;  %v1748_v44 = vmul.f32 -1.442695, %v517_v43  ;;  %v2118_v40 = vld [vmem:[#allocation9 + $0x1f4] ss:$8 sps:$4 sm:$0xff]  }
 0x163   :  { %2123 = vpow2.f32 %v1747_v42  ;;  %v981_v45 = vpop.f32.mrb[0].mxu0 }
 0x164   :  { %2125 = vpow2.f32 %v1748_v44  ;;  %v983_v46 = vpop.f32.mrb[1].mxu0 }
 0x165   :  { %v985_v48 = vpop.f32.mrb[2].mxu0 }
 0x166   :  { %v987_v50 = vpop.f32.mrb[3].mxu0 }
 0x16b   :  { %v2120_v47 = vpop.eup %2119 }
 0x16c   :  { %v2122_v49 = vpop.eup %2121  ;;  %v1057_v61 = vadd.f32 1.0, %v2120_v47 }
 0x16d   :  { %v2124_v51 = vpop.eup %2123  ;;  %v1058_v52 = vadd.f32 1.0, %v2122_v49 }
 0x16e   :  { %v2126_v53 = vpop.eup %2125  ;;  %2127 = vrcp.f32 %v1057_v61  ;;  %v1061_v54 = vadd.f32 1.0, %v2124_v51 }
 0x16f   :  { %2129 = vrcp.f32 %v1058_v52  ;;  %v1062_v55 = vadd.f32 1.0, %v2126_v53 }
 0x170   :  { %2131 = vrcp.f32 %v1061_v54 }
 0x171   :  { %2133 = vrcp.f32 %v1062_v55 }
 0x178   :  { %v2128_v56 = vpop.eup %2127 }
 0x179   :  { %v2130_v57 = vpop.eup %2129  ;;  %v1081_v58 = vmul.f32 %v2128_v56, %v511_v37  ;;  %v2110_v37 = vld [vmem:[#allocation9 + $0x1d0] ss:$8 sps:$4 sm:$0xff]  }
 0x17a   :  { %v2132_v59 = vpop.eup %2131  ;;  %v1082_v60 = vmul.f32 %v2130_v57, %v513_v39  ;;  %v2113_v39 = vld [vmem:[#allocation9 + $0x1e0] ss:$8 sps:$4 sm:$0xff]  }
 0x17b   :  { %v2134_v62 = vpop.eup %2133  ;;  %v1085_v63 = vmul.f32 %v2132_v59, %v515_v41  ;;  %v1089_v33 = vmul.f32 %v1081_v58, %v981_v45 }
 0x17c   :  { %v1086_v0 = vmul.f32 %v2134_v62, %v517_v43  ;;  %v1090_v1 = vmul.f32 %v1082_v60, %v983_v46  ;;  %v2116_v43 = vld [vmem:[#allocation9 + $0x1f0] ss:$8 sps:$4 sm:$0xff]  }
 0x17d   :  { %v1093_v2 = vmul.f32 %v1085_v63, %v985_v48 }
 0x17e   :  { %v1094_v3 = vmul.f32 %v1086_v0, %v987_v50 }
 0x17f   :  { %v1101_v4 = vpack.c.bf16 %v1093_v2, %v1089_v33 }
 0x180   :  { %v1102_v5 = vpack.c.bf16 %v1094_v3, %v1090_v1 }
 0x182   :  { %1521 = vmatprep.mubr.bf16.mxu0 %v1102_v5 }
 0x183   :  { %1522 = vmatmul.mubr.bf16.vlgmr.msra.gmra.mrb[4].mxu0 %v1101_v4 }
 0x184   :  { %1533 = vmatpush1.bf16.msra.mxu0 %v2071_v6 }
 0x185   :  { %1534 = vmatprep.subr.bf16.mxu0 %v2076_v7 }
 0x188   :  { %1535 = vmatpush1.bf16.msra.mxu0 %v2074_v8 }
 0x189   :  { %1536 = vmatprep.subr.bf16.mxu0 %v2079_v9 }
 0x18c   :  { %1537 = vmatpush1.bf16.msra.mxu0 %v2077_v10 }
 0x18d   :  { %1538 = vmatprep.subr.bf16.mxu0 %v2082_v11 }
 0x190   :  { %1539 = vmatpush1.bf16.msra.mxu0 %v2080_v12 }
 0x191   :  { %1540 = vmatprep.subr.bf16.mxu0 %v2085_v13 }
 0x194   :  { %1541 = vmatpush1.bf16.msra.mxu0 %v2083_v14 }
 0x195   :  { %1542 = vmatprep.subr.bf16.mxu0 %v2088_v15 }
 0x198   :  { %1543 = vmatpush1.bf16.msra.mxu0 %v2086_v16 }
 0x199   :  { %1544 = vmatprep.subr.bf16.mxu0 %v2091_v17 }
 0x19c   :  { %1545 = vmatpush1.bf16.msra.mxu0 %v2089_v18 }
 0x19d   :  { %1546 = vmatprep.subr.bf16.mxu0 %v2094_v19 }
 0x19e   :  { %v554_v22 = vpop.f32.mrb[4].mxu1 }
 0x19f   :  { %v556_v23 = vpop.f32.mrb[5].mxu1  ;;  %v1745_v41 = vmul.f32 -1.442695, %v554_v22 }
 0x1a0   :  { %v558_v24 = vpop.f32.mrb[6].mxu1  ;;  %1547 = vmatpush1.bf16.msra.mxu0 %v2092_v20  ;;  %v1746_v42 = vmul.f32 -1.442695, %v556_v23 }
 0x1a1   :  { %v560_v26 = vpop.f32.mrb[7].mxu1  ;;  %1548 = vmatprep.subr.bf16.mxu0 %v2097_v21  ;;  %v1749_v44 = vmul.f32 -1.442695, %v558_v24  ;;  %2135 = vpow2.f32 %v1745_v41 }
 0x1a2   :  { %v1750_v45 = vmul.f32 -1.442695, %v560_v26  ;;  %2137 = vpow2.f32 %v1746_v42 }
 0x1a3   :  { %2139 = vpow2.f32 %v1749_v44 }
 0x1a4   :  { %1549 = vmatpush1.bf16.msra.mxu0 %v2095_v25  ;;  %2141 = vpow2.f32 %v1750_v45 }
 0x1a5   :  { %1550 = vmatprep.subr.bf16.mxu0 %v2100_v27 }
 0x1a8   :  { %1551 = vmatpush1.bf16.msra.mxu0 %v2098_v28 }
 0x1a9   :  { %1552 = vmatprep.subr.bf16.mxu0 %v2103_v29 }
 0x1ab   :  { %v2136_v46 = vpop.eup %2135 }
 0x1ac   :  { %1553 = vmatpush1.bf16.msra.mxu0 %v2101_v30  ;;  %v2138_v47 = vpop.eup %2137  ;;  %v1059_v61 = vadd.f32 1.0, %v2136_v46 }
 0x1ad   :  { %1554 = vmatprep.subr.bf16.mxu0 %v2106_v31  ;;  %v2140_v48 = vpop.eup %2139  ;;  %v1060_v50 = vadd.f32 1.0, %v2138_v47 }
 0x1ae   :  { %v2142_v49 = vpop.eup %2141  ;;  %v1063_v51 = vadd.f32 1.0, %v2140_v48  ;;  %2143 = vrcp.f32 %v1059_v61 }
 0x1af   :  { %v1064_v52 = vadd.f32 1.0, %v2142_v49  ;;  %2145 = vrcp.f32 %v1060_v50 }
 0x1b0   :  { %1555 = vmatpush1.bf16.msra.mxu0 %v2104_v32  ;;  %2147 = vrcp.f32 %v1063_v51 }
 0x1b1   :  { %1556 = vmatprep.subr.bf16.mxu0 %v2109_v34  ;;  %2149 = vrcp.f32 %v1064_v52 }
 0x1b4   :  { %1557 = vmatpush1.bf16.msra.mxu0 %v2107_v35 }
 0x1b5   :  { %1558 = vmatprep.subr.bf16.mxu0 %v2112_v36 }
 0x1b8   :  { %1559 = vmatpush1.bf16.msra.mxu0 %v2110_v37  ;;  %v2144_v53 = vpop.eup %2143 }
 0x1b9   :  { %1560 = vmatprep.subr.bf16.mxu0 %v2115_v38  ;;  %v2146_v54 = vpop.eup %2145  ;;  %v1083_v57 = vmul.f32 %v2144_v53, %v554_v22 }
 0x1ba   :  { %v2148_v55 = vpop.eup %2147  ;;  %v1084_v58 = vmul.f32 %v2146_v54, %v556_v23 }
 0x1bb   :  { %v2150_v56 = vpop.eup %2149  ;;  %v1087_v60 = vmul.f32 %v2148_v55, %v558_v24 }
 0x1bc   :  { %1561 = vmatpush1.bf16.msra.mxu0 %v2113_v39  ;;  %v1088_v33 = vmul.f32 %v2150_v56, %v560_v26 }
 0x1bd   :  { %1562 = vmatprep.subr.bf16.mxu0 %v2118_v40 }
 0x1c0   :  { %1563 = vmatpush1.bf16.msra.mxu0 %v2116_v43 }
 0x1de   :  { %v1024_v59 = vpop.f32.mrb[8].mxu1 }
 0x1df   :  { %v1091_v62 = vmul.f32 %v1083_v57, %v1024_v59  ;;  %v1026_v63 = vpop.f32.mrb[9].mxu1 }
 0x1e0   :  { %v1092_v0 = vmul.f32 %v1084_v58, %v1026_v63  ;;  %v1028_v1 = vpop.f32.mrb[10].mxu1 }
 0x1e1   :  { %v1095_v2 = vmul.f32 %v1087_v60, %v1028_v1  ;;  %v1030_v3 = vpop.f32.mrb[11].mxu1 }
 0x1e2   :  { %v1096_v4 = vmul.f32 %v1088_v33, %v1030_v3 }
 0x1e3   :  { %v1103_v5 = vpack.c.bf16 %v1095_v2, %v1091_v62 }
 0x1e4   :  { %v1104_v6 = vpack.c.bf16 %v1096_v4, %v1092_v0 }
 0x1e6   :  { %1564 = vmatprep.mubr.bf16.mxu0 %v1104_v6 }
 0x1e7   :  { %1565 = vmatmul.mubr.bf16.vlgmr.msra.gmra.mrb[4].mxu0 %v1103_v5 }
 0x2ba   :  { %v1566_v7 = vpop.f32.mrb[4].mxu0 }
 0x2bb   :  { %1590 = vst [vmem:[#allocation11] sm:$0xff] %v1566_v7  ;;  %v1568_v8 = vpop.f32.mrb[5].mxu0 }
 0x2bc   :  { %1591 = vst [vmem:[#allocation11 + $0x8] sm:$0xff] %v1568_v8  ;;  %v1570_v9 = vpop.f32.mrb[6].mxu0 }
 0x2bd   :  { %1592 = vst [vmem:[#allocation11 + $0x10] sm:$0xff] %v1570_v9  ;;  %v1572_v10 = vpop.f32.mrb[7].mxu0 }
 0x2be   :  { %1593 = vst [vmem:[#allocation11 + $0x18] sm:$0xff] %v1572_v10 }
 0x2bf   :  { %2250 = shalt.err (!%p2247_p8)
}
 0x2c0   :  { %s2251_s17 = scalar_lea.hbm %s2401_s4, 512 }
 0x2c1   :  { %p2252_p9 = scmp.ne.s32.totalorder %s2401_s4, %s2251_s17  ;;  %p2255_p10 = scmp.lt.u32.totalorder %s2251_s17, %s2401_s4 }
 0x2c3   :  { %p2257_p11 = pnand %p2255_p10, %p2252_p9 }
 0x2c5   :  { %2260 = shalt.err (!%p2257_p11)
}
 0x2c6   :  { %1605 = dma.vmem_to_hbm [thread:$0]  %s1600_s1, 512, %s2401_s4, [#allocation5], %s2270_s25, %s2270_s25, %s2271_s26  }
 0x2c7   :  { %2267 = dma.done.wait [#allocation5], 512  }
 0x2c8   :  { %2268 = vsyncadd [#allocation5], 4294966784 }
 0x2c9   :  { %1609 = vsyncpa [#allocation4], 1 }
 0x2ca   :  { %1610 = vsyncpa [#allocation7], 1 }
 0x2cb   :  { %1611 = vsyncpa [#allocation10], 1 }
 0x2cc   :  { %1612 = vsyncpa [#allocation5], 1 }

</bundles_post_ra>
